<compile_context>
chip_gen: v6e
topology: v6e:2x2x1
jax: 0.10.0
libtpu: 0.0.40
codegen_flags: <defaults>
</compile_context>

<pallas_src>
import functools

import jax
import jax.numpy as jnp
from jax.experimental import pallas as pl
from jax.experimental.pallas import tpu as pltpu


def _round_up(x, m):
    return (x + m - 1) // m * m


# --------------------------------------------------------------------------
# Kernel body: one tile of tokens.
# --------------------------------------------------------------------------
def _lora_qkv_kernel(x_ref, wext_ref, bias_ref, bblk_ref, o_ref, *, dim):
    """x_ref    : (tm, C)        compute dtype (bf16)
    wext_ref : (C, 3C + 2r)   [W_qkv | A_q | A_v]      (grid-invariant)
    bias_ref : (1, 3C)        f32 qkv bias             (grid-invariant)
    bblk_ref : (2r, 2C)       block-diag(B_q, B_v)     (grid-invariant)
    o_ref    : (tm, 3C)       out dtype
    """
    x = x_ref[...]

    # Single fused first-stage MXU pass: [x@W_qkv | x@A_q | x@A_v], f32 acc.
    h = jnp.dot(x, wext_ref[...], preferred_element_type=jnp.float32)

    # Single second-stage low-rank matmul: (tm, 2r) @ blockdiag(B_q, B_v).
    # Columns [:dim] = new_q, columns [dim:] = new_v.
    # NOTE: the rank-r intermediate is rounded back to bf16 before the B
    # matmul (one extra rounding vs. the PyTorch f32 reference) — negligible
    # at rank 4..64 and covered by the test tolerance.
    lora = jnp.dot(h[:, 3 * dim:].astype(bblk_ref.dtype), bblk_ref[...],
                   preferred_element_type=jnp.float32)

    bias = bias_ref[...]  # (1, 3C), broadcasts over rows.

    # Direct slab stores — no concatenate, no extra full-tile VMEM copy.
    # For real ViT dims C is a multiple of 128 so these are lane-aligned.
    o_ref[:, :dim] = (h[:, :dim] + bias[:, :dim]
                      + lora[:, :dim]).astype(o_ref.dtype)
    o_ref[:, dim:2 * dim] = (h[:, dim:2 * dim]
                             + bias[:, dim:2 * dim]).astype(o_ref.dtype)
    o_ref[:, 2 * dim:] = (h[:, 2 * dim:3 * dim] + bias[:, 2 * dim:]
                          + lora[:, dim:]).astype(o_ref.dtype)


# --------------------------------------------------------------------------
# One-time weight packing (hoisted out of the per-call path).
# --------------------------------------------------------------------------
def pack_lora_qkv_weights(w_qkv, b_qkv, a_q, b_q, a_v, b_v,
                          compute_dtype=jnp.bfloat16):
    """Weights stored (in, out):  w_qkv (C,3C), a_* (C,r), b_* (r,C)."""
    C = w_qkv.shape[0]
    r = a_q.shape[1]
    if r == 0:  # no-LoRA edge case: substitute rank-1 zero adapters.
        a_q = jnp.zeros((C, 1), w_qkv.dtype)
        b_q = jnp.zeros((1, C), w_qkv.dtype)
        a_v = jnp.zeros((C, 1), w_qkv.dtype)
        b_v = jnp.zeros((1, C), w_qkv.dtype)
        r = 1

    w_ext = jnp.concatenate([w_qkv, a_q, a_v], axis=1).astype(compute_dtype)
    b_blk = jnp.zeros((2 * r, 2 * C), dtype=compute_dtype)
    b_blk = b_blk.at[:r, :C].set(b_q.astype(compute_dtype))
    b_blk = b_blk.at[r:, C:].set(b_v.astype(compute_dtype))
    bias = b_qkv.astype(jnp.float32).reshape(1, 3 * C)
    return {"w_ext": w_ext, "bias": bias, "b_blk": b_blk, "dim": C, "rank": r}


# --------------------------------------------------------------------------
# Tile selection per TPU generation + padding-waste minimization.
# --------------------------------------------------------------------------
def _max_tile_for_device():
    try:
        kind = jax.devices()[0].device_kind.lower()
    except Exception:
        return 256
    if "v5" in kind:
        return 128   # v5e: 128-wide MXU, 16 MiB default scoped VMEM.
    if "v6" in kind:
        return 512   # v6e: 128 MiB VMEM; big tiles amortize step overhead.
    return 256       # v7x (64 MiB/TC) and unknown chips.


def _select_tm(M, max_tm):
    if M <= 128:
        return min(max_tm, max(8, _round_up(M, 8)))
    chosen = None
    for cand in (512, 256, 128):          # prefer the largest acceptable tile
        if cand > max_tm:
            continue
        waste = (-M) % cand
        if waste / (M + waste) <= 0.04:   # <4% padded rows -> take it
            return cand
        if chosen is None or waste < chosen[1]:
            chosen = (cand, waste)
    return chosen[0] if chosen else min(max_tm, 128)


def _const_spec(shape):
    """Grid-invariant operand: single-buffered (no double-buffer VMEM waste)."""
    try:
        return pl.BlockSpec(shape, lambda i: (0,) * len(shape),
                            pipeline_mode=pl.Buffered(1))
    except (TypeError, AttributeError):
        # Older JAX without pipeline_mode / Buffered: fall back to default.
        return pl.BlockSpec(shape, lambda i: (0,) * len(shape))


# --------------------------------------------------------------------------
# Forward pass.
# --------------------------------------------------------------------------
def lora_qkv_timm_packed(x, packed, *, tm=None, compute_dtype=jnp.bfloat16,
                         out_dtype=None):
    """x: (B, N, C) -> (B, N, 3C) using pre-packed weights."""
    B, N, C = x.shape
    assert packed["dim"] == C, "packed weights do not match x's channel dim"
    r = packed["rank"]
    out3 = 3 * C
    out_dtype = compute_dtype if out_dtype is None else out_dtype

    M = B * N
    if tm is None:
        tm = _select_tm(M, _max_tile_for_device())
    tm = min(tm, _round_up(M, 8))
    M_pad = _round_up(M, tm)

    x2d = x.reshape(M, C).astype(compute_dtype)
    if M_pad != M:
        x2d = jnp.pad(x2d, ((0, M_pad - M), (0, 0)))

    # VMEM budget: double-buffered x/out tiles + single-buffered weights.
    cbytes = jnp.dtype(compute_dtype).itemsize
    obytes = jnp.dtype(out_dtype).itemsize
    vmem_est = (2 * tm * C * cbytes                 # x tile, 2 buffers
                + 2 * tm * out3 * obytes            # out tile, 2 buffers
                + C * (out3 + 2 * r) * cbytes       # [W|Aq|Av], 1 buffer
                + out3 * 4                          # f32 bias
                + 2 * r * 2 * C * cbytes)           # blockdiag(Bq,Bv)
    vmem_limit = min(64 * 1024 * 1024,
                     max(32 * 1024 * 1024, int(vmem_est * 1.25) + (1 << 20)))

    kernel = functools.partial(_lora_qkv_kernel, dim=C)

    out2d = pl.pallas_call(
        kernel,
        out_shape=jax.ShapeDtypeStruct((M_pad, out3), out_dtype),
        grid_spec=pltpu.PrefetchScalarGridSpec(
            num_scalar_prefetch=0,
            grid=(M_pad // tm,),
            in_specs=[
                pl.BlockSpec((tm, C), lambda i: (i, 0)),   # x tile (pipelined)
                _const_spec((C, out3 + 2 * r)),            # [W | Aq | Av]
                _const_spec((1, out3)),                    # f32 bias
                _const_spec((2 * r, 2 * C)),               # blockdiag(Bq, Bv)
            ],
            out_specs=pl.BlockSpec((tm, out3), lambda i: (i, 0)),
        ),
        compiler_params=pltpu.CompilerParams(
            dimension_semantics=("parallel",),   # shards grid across TCs (v7x)
            vmem_limit_bytes=vmem_limit),
    )(x2d, packed["w_ext"], packed["bias"], packed["b_blk"])

    return out2d[:M].reshape(B, N, out3)


def lora_qkv_timm(x, w_qkv, b_qkv, a_q, b_q, a_v, b_v, *, tm=None,
                  compute_dtype=jnp.bfloat16, out_dtype=None):
    """Convenience wrapper: packs weights (do this once at init in real use)."""
    packed = pack_lora_qkv_weights(w_qkv, b_qkv, a_q, b_q, a_v, b_v,
                                   compute_dtype=compute_dtype)
    return lora_qkv_timm_packed(x, packed, tm=tm, compute_dtype=compute_dtype,
                                out_dtype=out_dtype)


# --------------------------------------------------------------------------
# Plain-JAX f32 reference matching the PyTorch forward.
# --------------------------------------------------------------------------
def _reference(x, w_qkv, b_qkv, a_q, b_q, a_v, b_v):
    B, N, C = x.shape
    qkv = jnp.einsum("bnc,cd->bnd", x, w_qkv) + b_qkv.reshape(-1)
    new_q = jnp.einsum("bnr,rc->bnc", jnp.einsum("bnc,cr->bnr", x, a_q), b_q)
    new_v = jnp.einsum("bnr,rc->bnc", jnp.einsum("bnc,cr->bnr", x, a_v), b_v)
    qkv = qkv.at[:, :, :C].add(new_q)
    qkv = qkv.at[:, :, -C:].add(new_v)
    return qkv


if __name__ == "__main__":
    # Small shapes consistent with the module: B=2, N=8 tokens, dim=32, rank=4.
    # (At this toy scale 3C=96 < 128 lanes so stores are masked; real ViT dims
    #  C in {768, 1024, 1280} give lane-aligned, unmasked slab stores.)
    B, N, C, R = 2, 8, 32, 4
    key = jax.random.PRNGKey(0)
    kx, kw, kb, k1, k2, k3, k4 = jax.random.split(key, 7)

    x = jax.random.normal(kx, (B, N, C), dtype=jnp.float32)

    # qkv = nn.Linear(C, 3C, bias=True); LoRA A: (C -> R), LoRA B: (R -> C).
    # Stored as (in, out) so the kernel computes x @ W.
    w_qkv = jax.random.normal(kw, (C, 3 * C), dtype=jnp.float32) * 0.05
    b_qkv = jax.random.normal(kb, (1, 3 * C), dtype=jnp.float32) * 0.05
    a_q = jax.random.normal(k1, (C, R), dtype=jnp.float32) * 0.1
    b_q = jax.random.normal(k2, (R, C), dtype=jnp.float32) * 0.1
    a_v = jax.random.normal(k3, (C, R), dtype=jnp.float32) * 0.1
    b_v = jax.random.normal(k4, (R, C), dtype=jnp.float32) * 0.1

    # Pack once (hoisted out of the per-forward path), then run the kernel.
    packed = pack_lora_qkv_weights(w_qkv, b_qkv, a_q, b_q, a_v, b_v)
    out = lora_qkv_timm_packed(x, packed)
    out = jax.block_until_ready(out)

    ref = _reference(x, w_qkv, b_qkv, a_q, b_q, a_v, b_v)
    assert out.shape == (B, N, 3 * C)
    # bf16 compute/output with f32 accumulation -> ~1e-2 agreement vs f32 ref.
    assert jnp.allclose(out.astype(jnp.float32), ref, atol=2e-2, rtol=2e-2)

    print("KERNEL_OK")
</pallas_src>

<mosaic_0001>
module attributes {stable_mosaic.version = 11 : i64} {
  func.func @_lora_qkv_kernel(%arg0: i32, %arg1: memref<16x32xbf16, #tpu.memory_space<vmem>>, %arg2: memref<32x104xbf16, #tpu.memory_space<vmem>>, %arg3: memref<1x96xf32, #tpu.memory_space<vmem>>, %arg4: memref<8x64xbf16, #tpu.memory_space<vmem>>, %arg5: memref<16x96xbf16, #tpu.memory_space<vmem>>) attributes {dimension_semantics = [#tpu.dimension_semantics<parallel>], iteration_bounds = array<i64: 1>, scalar_prefetch = 0 : i64, scratch_operands = 0 : i64, tpu.core_type = #tpu.core_type<tc>, window_params = [{transform_indices = @transform_0, window_bounds = array<i64: 16, 32>}, {pipeline_mode = #tpu.pipeline_mode<synchronous>, transform_indices = @transform_1, window_bounds = array<i64: 32, 104>}, {pipeline_mode = #tpu.pipeline_mode<synchronous>, transform_indices = @transform_2, window_bounds = array<i64: 1, 96>}, {pipeline_mode = #tpu.pipeline_mode<synchronous>, transform_indices = @transform_3, window_bounds = array<i64: 8, 64>}, {transform_indices = @transform_4, window_bounds = array<i64: 16, 96>}]} {
    %c0 = arith.constant 0 : index
    %c0_0 = arith.constant 0 : index
    %0 = vector.load %arg1[%c0, %c0_0] : memref<16x32xbf16, #tpu.memory_space<vmem>>, vector<16x32xbf16>
    %c0_1 = arith.constant 0 : index
    %c0_2 = arith.constant 0 : index
    %1 = vector.load %arg2[%c0_1, %c0_2] : memref<32x104xbf16, #tpu.memory_space<vmem>>, vector<32x104xbf16>
    %cst = arith.constant dense<0.000000e+00> : vector<16x104xf32>
    %2 = tpu.matmul %0, %1, %cst {dimension_numbers = #tpu.dot_dimension_numbers<[1], [0], [0], [1], [0, 0, 1, 1], [], []>} : vector<16x32xbf16>, vector<32x104xbf16>, vector<16x104xf32> -> vector<16x104xf32>
    %3 = vector.extract_strided_slice %2 {offsets = [0, 96], sizes = [16, 8], strides = [1, 1]} : vector<16x104xf32> to vector<16x8xf32>
    %4 = arith.truncf %3 : vector<16x8xf32> to vector<16x8xbf16>
    %c0_3 = arith.constant 0 : index
    %c0_4 = arith.constant 0 : index
    %5 = vector.load %arg4[%c0_3, %c0_4] : memref<8x64xbf16, #tpu.memory_space<vmem>>, vector<8x64xbf16>
    %cst_5 = arith.constant dense<0.000000e+00> : vector<16x64xf32>
    %6 = tpu.matmul %4, %5, %cst_5 {dimension_numbers = #tpu.dot_dimension_numbers<[1], [0], [0], [1], [0, 0, 1, 1], [], []>} : vector<16x8xbf16>, vector<8x64xbf16>, vector<16x64xf32> -> vector<16x64xf32>
    %c0_6 = arith.constant 0 : index
    %c0_7 = arith.constant 0 : index
    %7 = vector.load %arg3[%c0_6, %c0_7] : memref<1x96xf32, #tpu.memory_space<vmem>>, vector<1x96xf32>
    %8 = vector.extract_strided_slice %2 {offsets = [0, 0], sizes = [16, 32], strides = [1, 1]} : vector<16x104xf32> to vector<16x32xf32>
    %9 = vector.extract_strided_slice %7 {offsets = [0, 0], sizes = [1, 32], strides = [1, 1]} : vector<1x96xf32> to vector<1x32xf32>
    %10 = vector.broadcast %9 : vector<1x32xf32> to vector<16x32xf32>
    %11 = arith.addf %8, %10 : vector<16x32xf32>
    %12 = vector.extract_strided_slice %6 {offsets = [0, 0], sizes = [16, 32], strides = [1, 1]} : vector<16x64xf32> to vector<16x32xf32>
    %13 = arith.addf %11, %12 : vector<16x32xf32>
    %14 = arith.truncf %13 : vector<16x32xf32> to vector<16x32xbf16>
    %c0_8 = arith.constant 0 : index
    %c0_9 = arith.constant 0 : index
    %15 = vector.load %arg5[%c0_8, %c0_9] : memref<16x96xbf16, #tpu.memory_space<vmem>>, vector<16x32xbf16>
    tpu.vector_store %arg5[%c0_8, %c0_9], %14 {strides = array<i32>} : memref<16x96xbf16, #tpu.memory_space<vmem>>, vector<16x32xbf16>,
    %16 = vector.extract_strided_slice %2 {offsets = [0, 32], sizes = [16, 32], strides = [1, 1]} : vector<16x104xf32> to vector<16x32xf32>
    %17 = vector.extract_strided_slice %7 {offsets = [0, 32], sizes = [1, 32], strides = [1, 1]} : vector<1x96xf32> to vector<1x32xf32>
    %18 = vector.broadcast %17 : vector<1x32xf32> to vector<16x32xf32>
    %19 = arith.addf %16, %18 : vector<16x32xf32>
    %20 = arith.truncf %19 : vector<16x32xf32> to vector<16x32xbf16>
    %c0_10 = arith.constant 0 : index
    %c32 = arith.constant 32 : index
    %21 = vector.load %arg5[%c0_10, %c32] : memref<16x96xbf16, #tpu.memory_space<vmem>>, vector<16x32xbf16>
    tpu.vector_store %arg5[%c0_10, %c32], %20 {strides = array<i32>} : memref<16x96xbf16, #tpu.memory_space<vmem>>, vector<16x32xbf16>,
    %22 = vector.extract_strided_slice %2 {offsets = [0, 64], sizes = [16, 32], strides = [1, 1]} : vector<16x104xf32> to vector<16x32xf32>
    %23 = vector.extract_strided_slice %7 {offsets = [0, 64], sizes = [1, 32], strides = [1, 1]} : vector<1x96xf32> to vector<1x32xf32>
    %24 = vector.broadcast %23 : vector<1x32xf32> to vector<16x32xf32>
    %25 = arith.addf %22, %24 : vector<16x32xf32>
    %26 = vector.extract_strided_slice %6 {offsets = [0, 32], sizes = [16, 32], strides = [1, 1]} : vector<16x64xf32> to vector<16x32xf32>
    %27 = arith.addf %25, %26 : vector<16x32xf32>
    %28 = arith.truncf %27 : vector<16x32xf32> to vector<16x32xbf16>
    %c0_11 = arith.constant 0 : index
    %c64 = arith.constant 64 : index
    %29 = vector.load %arg5[%c0_11, %c64] : memref<16x96xbf16, #tpu.memory_space<vmem>>, vector<16x32xbf16>
    tpu.vector_store %arg5[%c0_11, %c64], %28 {strides = array<i32>} : memref<16x96xbf16, #tpu.memory_space<vmem>>, vector<16x32xbf16>,
    return
  }
  func.func @transform_0(%arg0: i32) -> (i32, i32) {
    %c0_i32 = arith.constant 0 : i32
    %c0_i32_0 = arith.constant 0 : i32
    return %arg0, %c0_i32 : i32, i32
  }
  func.func @transform_1(%arg0: i32) -> (i32, i32) {
    %c0_i32 = arith.constant 0 : i32
    %c0_i32_0 = arith.constant 0 : i32
    %c0_i32_1 = arith.constant 0 : i32
    return %c0_i32, %c0_i32_0 : i32, i32
  }
  func.func @transform_2(%arg0: i32) -> (i32, i32) {
    %c0_i32 = arith.constant 0 : i32
    %c0_i32_0 = arith.constant 0 : i32
    %c0_i32_1 = arith.constant 0 : i32
    return %c0_i32, %c0_i32_0 : i32, i32
  }
  func.func @transform_3(%arg0: i32) -> (i32, i32) {
    %c0_i32 = arith.constant 0 : i32
    %c0_i32_0 = arith.constant 0 : i32
    %c0_i32_1 = arith.constant 0 : i32
    return %c0_i32, %c0_i32_0 : i32, i32
  }
  func.func @transform_4(%arg0: i32) -> (i32, i32) {
    %c0_i32 = arith.constant 0 : i32
    %c0_i32_0 = arith.constant 0 : i32
    return %arg0, %c0_i32 : i32, i32
  }
}

</mosaic_0001>

<bundles_post_ra>
// kernel: tpu_custom_call.1
= control target key start
LH: loop header
LB: loop body
LE: loop exit
PB: predicated region body
PF: predicated region fallthrough
CT: control target
= control target key end

     0   :  { %9 = vsyncpa [#allocation3], 0  ;;  %s412_s0 = inlined_call_operand.hbm [shape: bf16[16,32], index: 0, kind: input, shape index: {}]   ;;  %s413_s1 = inlined_call_operand.hbm [shape: bf16[32,104], index: 1, kind: input, shape index: {}]   ;;  %s414_s2 = inlined_call_operand.vmem [shape: f32[1,96], index: 2, kind: input, shape index: {}]   ;;  %s415_s3 = inlined_call_operand.vmem [shape: bf16[8,64], index: 3, kind: input, shape index: {}]   ;;  %s416_s4 = inlined_call_operand.hbm [shape: bf16[16,96], index: 4, kind: output, shape index: {}]  }
   0x1   :  { %10 = vsyncpa [#allocation6], 0 }
   0x2   :  { %11 = vsyncpa [#allocation4], 0  ;;  %s355_s15 = smov [#allocation2]  }
   0x3   :  { %s17_s16 = sshll.u32 %s355_s15, 4  ;;  %s18_s16 = int_to_ptr.vmem [resolvable:$true] %s17_s16 }
   0x4   :  { %s297_s17 = scalar_lea.vmem %s18_s16, 128  ;;  %p302_p1 = scmp.lt.s32.totalorder %s18_s16, %s18_s16 }
   0x5   :  { %p298_p0 = scmp.ne.s32.totalorder %s18_s16, %s297_s17  ;;  %p303_p2 = scmp.lt.s32.totalorder %s297_s17, %s297_s17 }
   0x7   :  { %p304_p3 = por %p303_p2, %p302_p1 }
   0x9   :  { %p305_p4 = pnand %p304_p3, %p298_p0 }
   0xb   :  { %308 = shalt.err (!%p305_p4)
}
   0xc   :  { %s356_s18 = smov 64   ;;  %s357_s19 = smov 4  }
   0xd   :  { %23 = dma.hbm_to_vmem [thread:$0]  %s412_s0, 128, %s18_s16, [#allocation3], %s356_s18, %s356_s18, %s357_s19  }
   0xe   :  { %s358_s22 = smov [#allocation5]  }
   0xf   :  { %s29_s23 = sshll.u32 %s358_s22, 4  ;;  %s30_s23 = int_to_ptr.vmem [resolvable:$true] %s29_s23 }
  0x10   :  { %s317_s24 = scalar_lea.vmem %s30_s23, 256  ;;  %p322_p6 = scmp.lt.s32.totalorder %s30_s23, %s30_s23 }
  0x11   :  { %p318_p5 = scmp.ne.s32.totalorder %s30_s23, %s317_s24  ;;  %p323_p7 = scmp.lt.s32.totalorder %s317_s24, %s317_s24 }
  0x13   :  { %p324_p8 = por %p323_p7, %p322_p6 }
  0x15   :  { %p325_p9 = pnand %p324_p8, %p318_p5 }
  0x17   :  { %328 = shalt.err (!%p325_p9)
}
  0x18   :  { %35 = dma.hbm_to_vmem [thread:$0]  %s413_s1, 256, %s30_s23, [#allocation6], %s356_s18, %s356_s18, %s357_s19  }
  0x19   :  { %349 = dma.done.wait [#allocation3], 128  }
  0x1a   :  { %350 = vsyncadd [#allocation3], 4294967168 }
  0x1b   :  { %351 = dma.done.wait [#allocation6], 256  }
  0x1c   :  { %352 = vsyncadd [#allocation6], 4294967040  ;;  %v359_v0 = vmov 0.0   ;;  %vm360_vm0 = vmmov 0   ;;  %v286_v1 = vld [vmem:[#allocation5 + $0x8] sm:$0xff]   ;;  %v287_v2 = vld [vmem:[#allocation5] sm:$0xff]  }
  0x1d   :  { %264 = vmatprep.subr.bf16.mxu0 %v359_v0  ;;  %268 = vmatprep.mubr.msk.bf16.mxu0 %vm360_vm0, %v359_v0  ;;  %v288_v3 = vld [vmem:[#allocation2] sm:$0xff]   ;;  %vm70_vm1 = vcmask 261120   ;;  %vm124_vm2 = vcmask 1043456   ;;  %s361_s27 = smov 32   ;;  %vm120_vm3 = vcmask 64512   ;;  %vm188_vm4 = vcmask 257024  }
  0x1e   :  { %272 = vmatprep.subr.bf16.mxu1 %v359_v0  ;;  %274 = vmatprep.mubr.msk.bf16.mxu1 %vm360_vm0, %v359_v0  ;;  %v116_v4 = vld [vmem:[%s415_s3] sm:$0xf]  ;;  %vm199_vm5 = vcmask 519424   ;;  %vm220_vm6 = vcmask 781824  }
  0x1f   :  { %265 = vmatpush3.bf16.msra.mxu0 %v286_v1  ;;  %v126_v5 = vsel %vm124_vm2, %v116_v4, 0  ;;  %v246_v12 = vld [vmem:[%s414_s2] ss:$0 sm:$0xff]  ;;  %s362_s2 = smov [#allocation7]  }
  0x20   :  { %266 = vmatprep.subr.bf16.mxu0 %v359_v0  ;;  %273 = vmatpush3.bf16.msra.mxu1 %v126_v5  ;;  %s228_s3 = sshll.u32 %s362_s2, 4  ;;  %s229_s3 = int_to_ptr.vmem [resolvable:$true] %s228_s3 }
  0x21   :  { %s329_s30 = scalar_lea.vmem %s229_s3, 128  ;;  %p334_p11 = scmp.lt.s32.totalorder %s229_s3, %s229_s3 }
  0x22   :  { %p330_p10 = scmp.ne.s32.totalorder %s229_s3, %s329_s30  ;;  %p335_p12 = scmp.lt.s32.totalorder %s329_s30, %s329_s30 }
  0x23   :  { %267 = vmatpush3.bf16.msra.mxu0 %v287_v2 }
  0x24   :  { %p336_p13 = por %p335_p12, %p334_p11 }
  0x26   :  { %269 = vmatmul.mubr.msk.bf16.vlgmr.msra.gmra.mxu0 %vm70_vm1, %v288_v3  ;;  %p337_p0 = pnand %p336_p13, %p330_p10 }
  0xe6   :  { %v108_v6 = vpop.f32.mrf.mxu0 }
  0xe7   :  { %v176_v13 = vadd.f32 %v246_v12, %v108_v6 }
  0xe8   :  { %v270_v7 = vpop.f32.mrf.mxu0 }
  0xe9   :  { %v255_v19 = vpack.c.bf16 %v176_v13, %v176_v13 }
  0xea   :  { %v111_v8 = vpop.f32.mrf.mxu0 }
  0xeb   :  { %v115_v9 = vpack.c.bf16 %v111_v8, %v108_v6  ;;  %v177_v17 = vadd.f32 %v246_v12, %v111_v8 }
  0xec   :  { %v271_v10 = vpop.f32.mrf.mxu0 }
  0xed   :  { %118 = vrot.lane.b32.xlu0 %v115_v9, %s361_s27  ;;  %v256_v24 = vpack.c.bf16 %v177_v17, %v177_v17 }
 0x15f   :  { %v119_v11 = vpop.permute.xlu0 %118 }
 0x160   :  { %275 = vmatmul.mubr.msk.bf16.vlgmr.msra.gmra.mxu1 %vm120_vm3, %v119_v11 }
 0x220   :  { %v162_v14 = vpop.f32.mrf.mxu1 }
 0x221   :  { %v178_v15 = vadd.f32 %v176_v13, %v162_v14  ;;  %204 = vrot.lane.b32.xlu0 %v162_v14, %s361_s27 }
 0x222   :  { %v276_v16 = vpop.f32.mrf.mxu1 }
 0x223   :  { %v253_v18 = vpack.c.bf16 %v178_v15, %v178_v15 }
 0x224   :  { %v165_v20 = vpop.f32.mrf.mxu1 }
 0x225   :  { %189 = vst.msk [vmem:[#allocation7] sm:$0xf] %vm188_vm4, %v253_v18  ;;  %v179_v21 = vadd.f32 %v177_v17, %v165_v20  ;;  %206 = vrot.lane.b32.xlu1 %v165_v20, %s361_s27 }
 0x226   :  { %v277_v22 = vpop.f32.mrf.mxu1  ;;  %200 = vst.msk [vmem:[#allocation7] sm:$0xf] %vm199_vm5, %v255_v19 }
 0x227   :  { %v254_v23 = vpack.c.bf16 %v179_v21, %v179_v21 }
 0x229   :  { %190 = vst.msk [vmem:[#allocation7 + $0x4] sm:$0xf] %vm188_vm4, %v254_v23 }
 0x22a   :  { %201 = vst.msk [vmem:[#allocation7 + $0x4] sm:$0xf] %vm199_vm5, %v256_v24 }
 0x293   :  { %v205_v25 = vpop.permute.xlu0 %204 }
 0x294   :  { %v210_v26 = vadd.f32 %v205_v25, %v176_v13 }
 0x296   :  { %v257_v27 = vpack.c.bf16 %v210_v26, %v210_v26 }
 0x297   :  { %v207_v28 = vpop.permute.xlu1 %206 }
 0x298   :  { %v211_v29 = vadd.f32 %v207_v28, %v177_v17  ;;  %221 = vst.msk [vmem:[#allocation7] sm:$0xf] %vm220_vm6, %v257_v27 }
 0x29a   :  { %v258_v30 = vpack.c.bf16 %v211_v29, %v211_v29 }
 0x29c   :  { %222 = vst.msk [vmem:[#allocation7 + $0x4] sm:$0xf] %vm220_vm6, %v258_v30 }
 0x29d   :  { %340 = shalt.err (!%p337_p0)
}
 0x29e   :  { %234 = dma.vmem_to_hbm [thread:$0]  %s229_s3, 128, %s416_s4, [#allocation4], %s356_s18, %s356_s18, %s357_s19  }
 0x29f   :  { %353 = dma.done.wait [#allocation4], 128  }
 0x2a0   :  { %354 = vsyncadd [#allocation4], 4294967168 }
 0x2a1   :  { %238 = vsyncpa [#allocation3], 1 }
 0x2a2   :  { %239 = vsyncpa [#allocation6], 1 }
 0x2a3   :  { %240 = vsyncpa [#allocation4], 1 }

</bundles_post_ra>
